<compile_context>
chip_gen: v7x
topology: tpu7x:2x2x1
jax: 0.10.0
libtpu: 0.0.40
codegen_flags: <defaults>
</compile_context>

<pallas_src>
import functools

import jax
import jax.numpy as jnp
from jax.experimental import pallas as pl
from jax.experimental.pallas import tpu as pltpu


def _nan_to_num_kernel(x_ref, o_ref, *, nan_value, posinf, neginf):
    x = x_ref[...]
    dt = x.dtype
    # clip maps +Inf -> posinf and -Inf -> neginf; finite values are unchanged
    # (bounds are the dtype's finite extrema). NaN is fixed by the select,
    # whose predicate is on the *original* x, so NaN propagation in clip is moot.
    y = jnp.clip(x, jnp.asarray(neginf, dt), jnp.asarray(posinf, dt))
    o_ref[...] = jnp.where(jnp.isnan(x), jnp.asarray(nan_value, dt), y)


def _nan_to_num_flat_aligned(flat, lane, value, posinf, neginf):
    """Run the Pallas kernel on a flat array whose length is a multiple of `lane`."""
    dtype = flat.dtype
    itemsize = jnp.dtype(dtype).itemsize
    n = flat.shape[0]

    x2d = flat.reshape(-1, lane)  # contiguous reshape: free, no copy
    rows = x2d.shape[0]

    # dtype-aware sublane packing: 8 (f32), 16 (bf16/f16), 32 (8-bit).
    pack = 8 * max(1, 4 // itemsize)

    # ~4 MiB blocks: amortizes the ~0.35us per-grid-step overhead even at
    # v7x's ~3.2 TB/s HBM, while in+out double-buffering (4 x 4 MiB = 16 MiB)
    # stays well under the explicit 48 MiB scoped-VMEM limit below.
    max_block_rows = max(pack, (4 * 1024 * 1024) // (lane * itemsize))

    if rows <= pack:
        block_rows = rows  # single full-extent block (tiny input)
    else:
        # Aim for >= ~4 grid steps so both v7x TensorCores get work and the
        # DMA/compute pipeline has something to overlap; never exceed the cap.
        quarter = max(pack, ((rows // 4) // pack) * pack)
        block_rows = min(max_block_rows, quarter)

    grid = (pl.cdiv(rows, block_rows),)

    kernel = functools.partial(
        _nan_to_num_kernel, nan_value=float(value), posinf=posinf, neginf=neginf
    )

    cost = pl.CostEstimate(
        flops=4 * n,                       # clip (2) + isnan + select per element
        transcendentals=0,
        bytes_accessed=2 * n * itemsize,   # one read + one write of the tensor
    )

    out2d = pl.pallas_call(
        kernel,
        out_shape=jax.ShapeDtypeStruct(x2d.shape, dtype),
        grid=grid,
        in_specs=[pl.BlockSpec((block_rows, lane), lambda i: (i, 0))],
        out_specs=pl.BlockSpec((block_rows, lane), lambda i: (i, 0)),
        compiler_params=pltpu.CompilerParams(
            dimension_semantics=("parallel",),
            vmem_limit_bytes=48 * 1024 * 1024,
        ),
        cost_estimate=cost,
    )(x2d)

    return out2d.reshape(-1)


def nan_to_num(x: jax.Array, value: float = 0.0) -> jax.Array:
    """Pallas TPU equivalent of torch.nan_to_num(x, nan=value)."""
    orig_shape = x.shape
    dtype = x.dtype

    # Identity for non-floating dtypes (no NaN/Inf representable).
    if not jnp.issubdtype(dtype, jnp.floating):
        return x

    fin = jnp.finfo(dtype)
    posinf = float(fin.max)
    neginf = float(fin.min)

    flat = x.reshape(-1)
    n = flat.shape[0]
    if n == 0:
        return x

    # Widest lane-dense width that divides n -> zero host-side pad/slice copies.
    lane = next((l for l in (512, 256, 128) if n % l == 0), None)
    if lane is not None:
        out_flat = _nan_to_num_flat_aligned(flat, lane, value, posinf, neginf)
        return out_flat.reshape(orig_shape)

    # Ragged length: kernel on the 512-aligned prefix, tiny (<512 elem) tail
    # fixed with plain jnp.nan_to_num -- no full-tensor pad / slice round-trip.
    lane = 512
    n_main = (n // lane) * lane
    if n_main == 0:
        # Tensor smaller than one lane-dense row: not worth a kernel launch.
        return jnp.nan_to_num(x, nan=value, posinf=posinf, neginf=neginf)

    main_out = _nan_to_num_flat_aligned(flat[:n_main], lane, value, posinf, neginf)
    tail_out = jnp.nan_to_num(flat[n_main:], nan=value, posinf=posinf, neginf=neginf)
    out_flat = jnp.concatenate([main_out, tail_out])
    return out_flat.reshape(orig_shape)


if __name__ == "__main__":
    key = jax.random.PRNGKey(0)

    # NCHW activation-like input (lane-aligned path: 2*4*16*16 = 2048 elements).
    x = jax.random.normal(key, (2, 4, 16, 16), dtype=jnp.float32)
    x = x.at[0, 0, 0, 0].set(jnp.nan)
    x = x.at[0, 1, 2, 3].set(jnp.inf)
    x = x.at[1, 2, 5, 7].set(-jnp.inf)
    x = x.at[1, 3, 15, 15].set(jnp.nan)

    y = nan_to_num(x, value=0.0)
    jax.block_until_ready(y)
    y_ref = jnp.nan_to_num(x, nan=0.0)

    assert y.shape == x.shape and y.dtype == x.dtype
    assert not bool(jnp.any(jnp.isnan(y)))
    assert not bool(jnp.any(jnp.isinf(y)))
    assert bool(jnp.array_equal(y, y_ref))

    # Ragged-length path (5*130 = 650 elements, not a multiple of 128):
    # exercises the aligned-prefix kernel + jnp tail fixup.
    x2 = jax.random.normal(jax.random.PRNGKey(1), (5, 130), dtype=jnp.float32)
    x2 = x2.at[0, 0].set(jnp.nan)
    x2 = x2.at[4, 129].set(jnp.inf)
    y2 = nan_to_num(x2, value=-1.5)
    jax.block_until_ready(y2)
    y2_ref = jnp.nan_to_num(x2, nan=-1.5)
    assert bool(jnp.array_equal(y2, y2_ref))

    print("KERNEL_OK")
</pallas_src>

<mosaic_0001>
module attributes {stable_mosaic.version = 11 : i64} {
  func.func @_nan_to_num_kernel(%arg0: i32, %arg1: memref<4x512xf32, #tpu.memory_space<vmem>>, %arg2: memref<4x512xf32, #tpu.memory_space<vmem>>) attributes {dimension_semantics = [#tpu.dimension_semantics<parallel>], iteration_bounds = array<i64: 1>, scalar_prefetch = 0 : i64, scratch_operands = 0 : i64, tpu.core_type = #tpu.core_type<tc>, window_params = [{transform_indices = @transform_0, window_bounds = array<i64: 4, 512>}, {transform_indices = @transform_1, window_bounds = array<i64: 4, 512>}]} {
    %c0 = arith.constant 0 : index
    %c0_0 = arith.constant 0 : index
    %0 = vector.load %arg1[%c0, %c0_0] : memref<4x512xf32, #tpu.memory_space<vmem>>, vector<4x512xf32>
    %cst = arith.constant -3.40282347E+38 : f32
    %cst_1 = arith.constant 3.40282347E+38 : f32
    %1 = vector.broadcast %cst : f32 to vector<4x512xf32>
    %2 = arith.maximumf %1, %0 : vector<4x512xf32>
    %3 = vector.broadcast %cst_1 : f32 to vector<4x512xf32>
    %4 = arith.minimumf %3, %2 : vector<4x512xf32>
    %5 = arith.cmpf one, %0, %0 : vector<4x512xf32>
    %cst_2 = arith.constant 0.000000e+00 : f32
    %6 = vector.broadcast %cst_2 : f32 to vector<4x512xf32>
    %7 = arith.select %5, %6, %4 : vector<4x512xi1>, vector<4x512xf32>
    %c0_3 = arith.constant 0 : index
    %c0_4 = arith.constant 0 : index
    %8 = vector.load %arg2[%c0_3, %c0_4] : memref<4x512xf32, #tpu.memory_space<vmem>>, vector<4x512xf32>
    tpu.vector_store %arg2[%c0_3, %c0_4], %7 {strides = array<i32>} : memref<4x512xf32, #tpu.memory_space<vmem>>, vector<4x512xf32>,
    return
  }
  func.func @transform_0(%arg0: i32) -> (i32, i32) {
    %c0_i32 = arith.constant 0 : i32
    %c0_i32_0 = arith.constant 0 : i32
    return %arg0, %c0_i32 : i32, i32
  }
  func.func @transform_1(%arg0: i32) -> (i32, i32) {
    %c0_i32 = arith.constant 0 : i32
    %c0_i32_0 = arith.constant 0 : i32
    return %arg0, %c0_i32 : i32, i32
  }
}

</mosaic_0001>

<bundles_post_ra>
// kernel: tpu_custom_call.1
= control target key start
LH: loop header
LB: loop body
LE: loop exit
PB: predicated region body
PF: predicated region fallthrough
CT: control target
= control target key end

     0   :  { %6 = vsyncpa [#allocation3], 0  ;;  %s136_s0 = inlined_call_operand.hbm [shape: f32[4,512], index: 0, kind: input, shape index: {}]   ;;  %s137_s1 = inlined_call_operand.hbm [shape: f32[4,512], index: 1, kind: output, shape index: {}]  }
   0x1   :  { %7 = vsyncpa [#allocation4], 0  ;;  %s100_s6 = smov [#allocation2]   ;;  %s52_s10 = scalar_lea.hbm %s136_s0, 256 }
   0x2   :  { %s14_s7 = sshll.u32 %s100_s6, 4  ;;  %p53_p0 = scmp.ne.s32.totalorder %s136_s0, %s52_s10  ;;  %s15_s7 = int_to_ptr.vmem [resolvable:$true] %s14_s7 }
   0x3   :  { %p56_p1 = scmp.lt.u32.totalorder %s52_s10, %s136_s0 }
   0x5   :  { %p58_p2 = pnand %p56_p1, %p53_p0 }
   0x7   :  { %61 = shalt.err (!%p58_p2)
}
   0x8   :  { %s62_s15 = scalar_lea.vmem %s15_s7, 256  ;;  %p67_p4 = scmp.lt.s32.totalorder %s15_s7, %s15_s7 }
   0x9   :  { %p63_p3 = scmp.ne.s32.totalorder %s15_s7, %s62_s15  ;;  %p68_p5 = scmp.lt.s32.totalorder %s62_s15, %s62_s15 }
   0xb   :  { %p69_p6 = por %p68_p5, %p67_p4 }
   0xd   :  { %p70_p7 = pnand %p69_p6, %p63_p3 }
   0xf   :  { %73 = shalt.err (!%p70_p7)
}
  0x10   :  { %17 = dma.hbm_to_vmem [thread:$0]  %s136_s0, 256, %s15_s7, [#allocation3]  }
  0x11   :  { %96 = dma.done.wait [#allocation3], 256  }
  0x12   :  { %97 = vsyncadd [#allocation3], 4294967040  ;;  %s101_s18 = smov [#allocation5]   ;;  %v21_v0 = vld [vmem:[#allocation2] sm:$0xff]  ;;  %v22_v1 = vld [vmem:[#allocation2 + $0x8] sm:$0xff] }
  0x13   :  { %s39_s19 = sshll.u32 %s101_s18, 4  ;;  %v48_v2 = vclamps-f32 %v21_v0, 3.4028235e+38  ;;  %vm27_vm0 = vcmp.ne.f32.partialorder %v21_v0, %v21_v0  ;;  %v49_v3 = vclamps-f32 %v22_v1, 3.4028235e+38  ;;  %vm28_vm1 = vcmp.ne.f32.partialorder %v22_v1, %v22_v1  ;;  %s40_s19 = int_to_ptr.vmem [resolvable:$true] %s39_s19 }
  0x14   :  { %s74_s20 = scalar_lea.vmem %s40_s19, 256  ;;  %p79_p9 = scmp.lt.s32.totalorder %s40_s19, %s40_s19 }
  0x15   :  { %v29_v4 = vsel %vm27_vm0, 0.0, %v48_v2  ;;  %v30_v5 = vsel %vm28_vm1, 0.0, %v49_v3  ;;  %p75_p8 = scmp.ne.s32.totalorder %s40_s19, %s74_s20  ;;  %p80_p10 = scmp.lt.s32.totalorder %s74_s20, %s74_s20 }
  0x16   :  { %31 = vst [vmem:[#allocation5] sm:$0xff] %v29_v4  ;;  %32 = vst [vmem:[#allocation5 + $0x8] sm:$0xff] %v30_v5 }
  0x17   :  { %p81_p11 = por %p80_p10, %p79_p9 }
  0x19   :  { %p82_p12 = pnand %p81_p11, %p75_p8 }
  0x1b   :  { %85 = shalt.err (!%p82_p12)
}
  0x1c   :  { %s86_s22 = scalar_lea.hbm %s137_s1, 256 }
  0x1d   :  { %p87_p13 = scmp.ne.s32.totalorder %s137_s1, %s86_s22  ;;  %p90_p0 = scmp.lt.u32.totalorder %s86_s22, %s137_s1 }
  0x1f   :  { %p92_p1 = pnand %p90_p0, %p87_p13 }
  0x21   :  { %95 = shalt.err (!%p92_p1)
}
  0x22   :  { %42 = dma.vmem_to_hbm [thread:$0]  %s40_s19, 256, %s137_s1, [#allocation4]  }
  0x23   :  { %98 = dma.done.wait [#allocation4], 256  }
  0x24   :  { %99 = vsyncadd [#allocation4], 4294967040 }
  0x25   :  { %46 = vsyncpa [#allocation3], 1 }
  0x26   :  { %47 = vsyncpa [#allocation4], 1 }

</bundles_post_ra>
